<compile_context>
chip_gen: v5e
topology: v5e:2x2
jax: 0.10.0
libtpu: 0.0.40
codegen_flags: <defaults>
</compile_context>

<pallas_src>
import functools
import math

import jax
import jax.numpy as jnp
from jax.experimental import pallas as pl
from jax.experimental.pallas import tpu as pltpu

TOWERS = 5
NUM_AGG = 4       # mean, min, max, std           (PyG aggregator order)
NUM_SCALERS = 3   # identity, amplification, attenuation
_BIG = 3e38


# --------------------------- small helpers ---------------------------

def _round_up(v, m):
    return (v + m - 1) // m * m


def _vmem_capacity_bytes():
    try:
        return int(pltpu.get_tpu_info().vmem_capacity_bytes)
    except Exception:
        return 64 * 1024 * 1024          # conservative default = v7x per-TensorCore VMEM


def _compiler_params(dim_sem, vmem_bytes):
    kw = dict(dimension_semantics=tuple(dim_sem), vmem_limit_bytes=int(vmem_bytes))
    cls = getattr(pltpu, "CompilerParams", None) or getattr(pltpu, "TPUCompilerParams", None)
    if cls is not None:
        return cls(**kw)
    return dict(mosaic=kw)               # very old jax fallback


def _clamp_vmem(need, cap):
    return int(min(max(need, 16 << 20), int(cap * 0.9)))


def _pad2(a, rows, cols):
    return jnp.pad(a, ((0, rows - a.shape[0]), (0, cols - a.shape[1])))


# --------------------------- PNA edge-message kernel ---------------------------

def _pna_edge_kernel(ea_ref, dst_ref, src_ref, x_ref,
                     w_edge_ref, b_edge_ref, w_pre_d_ref, w_pre_s_ref, w_pre_e_ref, b_pre_ref,
                     m32_ref, mbf_ref, msq_ref):
    f32, bf16 = jnp.float32, jnp.bfloat16
    x = x_ref[...]                                                        # (N_pad, Fp) bf16, resident
    # edge encoder
    e = jnp.dot(ea_ref[...], w_edge_ref[...], preferred_element_type=f32) + b_edge_ref[...]
    # endpoint gathers as one-hot matmuls on the MXU (exact: selection of bf16 rows)
    x_i = jnp.dot(dst_ref[...], x, preferred_element_type=f32)            # target feats (te, Fp)
    x_j = jnp.dot(src_ref[...], x, preferred_element_type=f32)            # source feats (te, Fp)
    # the 5 tower pre-NNs fused into one matmul; [x_i | x_j | e] concat folded into row-split weights
    m = (jnp.dot(x_i.astype(bf16), w_pre_d_ref[...], preferred_element_type=f32)
         + jnp.dot(x_j.astype(bf16), w_pre_s_ref[...], preferred_element_type=f32)
         + jnp.dot(e.astype(bf16), w_pre_e_ref[...], preferred_element_type=f32)
         + b_pre_ref[...])                                                # (te, Cp)
    m32_ref[...] = m
    mbf_ref[...] = m.astype(bf16)
    msq_ref[...] = (m * m).astype(bf16)


def pna_edge_messages(x_bf, edge_attr_bf, dst_oh, src_oh, p, *, te, vmem_cap):
    E_pad, N_pad = dst_oh.shape
    Cp = p["b_pre"].shape[1]
    args = [edge_attr_bf, dst_oh, src_oh, x_bf,
            p["w_edge"], p["b_edge"], p["w_pre_d"], p["w_pre_s"], p["w_pre_e"], p["b_pre"]]
    in_specs = []
    for i, a in enumerate(args):
        if i < 3:                                   # per-edge operands: streamed edge tiles
            in_specs.append(pl.BlockSpec((te, a.shape[1]), lambda k: (k, 0)))
        else:                                       # x + weights: VMEM-resident constant blocks
            in_specs.append(pl.BlockSpec(a.shape, lambda k: (0, 0)))
    out_specs = (pl.BlockSpec((te, Cp), lambda k: (k, 0)),) * 3
    out_shape = (jax.ShapeDtypeStruct((E_pad, Cp), jnp.float32),
                 jax.ShapeDtypeStruct((E_pad, Cp), jnp.bfloat16),
                 jax.ShapeDtypeStruct((E_pad, Cp), jnp.bfloat16))
    need = (2 * te * (edge_attr_bf.shape[1] + 2 * N_pad) * 2      # streamed inputs, double-buffered
            + 2 * te * Cp * (4 + 2 + 2)                           # outputs, double-buffered
            + sum(int(a.size) * a.dtype.itemsize for a in args[3:])
            + (8 << 20))
    return pl.pallas_call(
        _pna_edge_kernel,
        out_shape=out_shape,
        grid_spec=pltpu.PrefetchScalarGridSpec(
            num_scalar_prefetch=0, grid=(E_pad // te,),
            in_specs=in_specs, out_specs=out_specs),
        compiler_params=_compiler_params(("parallel",), _clamp_vmem(need, vmem_cap)),
    )(*args)


# --------------------------- PNA node-update kernel ---------------------------

def _pna_node_kernel(adj_ref, m32_ref, mbf_ref, msq_ref, x_ref, stats_ref,
                     w_x_ref, w_mean_ref, w_min_ref, w_max_ref, w_std_ref, b_ref,
                     o_ref, sum_ref, sumsq_ref, amax_ref, amin_ref):
    f32, bf16 = jnp.float32, jnp.bfloat16
    k = pl.program_id(1)

    @pl.when(k == 0)
    def _():
        sum_ref[...] = jnp.zeros(sum_ref.shape, f32)
        sumsq_ref[...] = jnp.zeros(sumsq_ref.shape, f32)
        amax_ref[...] = jnp.full(amax_ref.shape, -_BIG, f32)
        amin_ref[...] = jnp.full(amin_ref.shape, _BIG, f32)

    adj_bf = adj_ref[...]                                                 # (tn, e_chunk) bf16 {0,1}
    # mean / std pieces via incidence matmuls (bf16 MXU, f32 accumulate)
    sum_ref[...] += jnp.dot(adj_bf, mbf_ref[...], preferred_element_type=f32)
    sumsq_ref[...] += jnp.dot(adj_bf, msq_ref[...], preferred_element_type=f32)
    # masked running min / max over this edge chunk (f32 VPU path, portable to v5e)
    sel = (adj_bf.astype(f32) > 0.0)[:, :, None]                          # (tn, e_chunk, 1)
    mc = m32_ref[...][None, :, :]                                         # (1, e_chunk, Cp)
    amax_ref[...] = jnp.maximum(amax_ref[...], jnp.max(jnp.where(sel, mc, -_BIG), axis=1))
    amin_ref[...] = jnp.minimum(amin_ref[...], jnp.min(jnp.where(sel, mc, _BIG), axis=1))

    @pl.when(k == pl.num_programs(1) - 1)
    def _():
        Fp = x_ref.shape[-1]
        stats = stats_ref[...]
        inv_deg, amp, att, nz = stats[:, 0:1], stats[:, 1:2], stats[:, 2:3], stats[:, 3:4]
        mean = sum_ref[...] * inv_deg
        var = sumsq_ref[...] * inv_deg - mean * mean
        std = jnp.sqrt(jnp.maximum(var, 0.0) + 1e-5)
        # empty neighbourhoods -> 0 (matches the scatter min/max fill of the reference)
        mmax = jnp.where(nz > 0.0, amax_ref[...], 0.0)
        mmin = jnp.where(nz > 0.0, amin_ref[...], 0.0)
        # fused 5-tower post-NN with conv Linear + eval-BN folded in; scaler outputs are
        # packed 128-aligned on the lane axis: [identity | amplification | attenuation]
        p_all = (jnp.dot(mean.astype(bf16), w_mean_ref[...], preferred_element_type=f32)
                 + jnp.dot(mmin.astype(bf16), w_min_ref[...], preferred_element_type=f32)
                 + jnp.dot(mmax.astype(bf16), w_max_ref[...], preferred_element_type=f32)
                 + jnp.dot(std.astype(bf16), w_std_ref[...], preferred_element_type=f32))
        y = (jnp.dot(x_ref[...], w_x_ref[...], preferred_element_type=f32)
             + p_all[:, :Fp] + amp * p_all[:, Fp:2 * Fp] + att * p_all[:, 2 * Fp:]
             + b_ref[...])
        o_ref[...] = jnp.maximum(y, 0.0).astype(o_ref.dtype)              # ReLU (BN folded at init)


def pna_node_update(adj, m32, mbf, msq, x_bf, stats, p, *, tn, e_chunk, vmem_cap):
    N_pad, E_pad = adj.shape
    Fp = x_bf.shape[1]
    Cp = m32.shape[1]
    grid = (N_pad // tn, E_pad // e_chunk)
    in_specs = [
        pl.BlockSpec((tn, e_chunk), lambda j, k: (j, k)),        # adj tile
        pl.BlockSpec((e_chunk, Cp), lambda j, k: (k, 0)),        # m (f32)
        pl.BlockSpec((e_chunk, Cp), lambda j, k: (k, 0)),        # m (bf16)
        pl.BlockSpec((e_chunk, Cp), lambda j, k: (k, 0)),        # m^2 (bf16)
        pl.BlockSpec((tn, Fp), lambda j, k: (j, 0)),             # x tile
        pl.BlockSpec((tn, 4), lambda j, k: (j, 0)),              # degree stats tile
        pl.BlockSpec(p["w_x"].shape, lambda j, k: (0, 0)),
        pl.BlockSpec(p["w_agg_mean"].shape, lambda j, k: (0, 0)),
        pl.BlockSpec(p["w_agg_min"].shape, lambda j, k: (0, 0)),
        pl.BlockSpec(p["w_agg_max"].shape, lambda j, k: (0, 0)),
        pl.BlockSpec(p["w_agg_std"].shape, lambda j, k: (0, 0)),
        pl.BlockSpec(p["b_out"].shape, lambda j, k: (0, 0)),
    ]
    out_specs = pl.BlockSpec((tn, Fp), lambda j, k: (j, 0))
    wbytes = sum(int(p[k].size) * p[k].dtype.itemsize
                 for k in ("w_x", "w_agg_mean", "w_agg_min", "w_agg_max", "w_agg_std", "b_out"))
    need = (2 * tn * e_chunk * Cp * 4           # the two masked-select temporaries
            + 4 * tn * e_chunk * 2              # adj blocks, double-buffered
            + 2 * e_chunk * Cp * (4 + 2 + 2)    # message blocks, double-buffered
            + 4 * tn * Cp * 4                   # scratch accumulators
            + 4 * tn * Fp * 2                   # x / out blocks
            + wbytes + (8 << 20))
    return pl.pallas_call(
        _pna_node_kernel,
        out_shape=jax.ShapeDtypeStruct((N_pad, Fp), jnp.bfloat16),
        grid_spec=pltpu.PrefetchScalarGridSpec(
            num_scalar_prefetch=0, grid=grid,
            in_specs=in_specs, out_specs=out_specs,
            scratch_shapes=[pltpu.VMEM((tn, Cp), jnp.float32) for _ in range(4)]),
        compiler_params=_compiler_params(("parallel", "arbitrary"), _clamp_vmem(need, vmem_cap)),
    )(adj, m32, mbf, msq, x_bf, stats,
      p["w_x"], p["w_agg_mean"], p["w_agg_min"], p["w_agg_max"], p["w_agg_std"], p["b_out"])


# --------------------------- pooling + dense head kernel ---------------------------

def _head_kernel(*refs, n_fing):
    f32, bf16 = jnp.float32, jnp.bfloat16
    (pool_ref, x_ref, fing_ref, w1, b1, w2, b2, w3, b3) = refs[:9]
    fp = refs[9: 9 + 2 * n_fing]
    (fw_out, fb_out, cw_g, cw_f, cb, pw, pb, o_ref) = refs[9 + 2 * n_fing:]

    def mm(a, w_ref):
        return jnp.dot(a.astype(bf16), w_ref[...], preferred_element_type=f32)

    # global_add_pool as one-hot matmul
    g = jnp.dot(pool_ref[...], x_ref[...], preferred_element_type=f32)
    # model2 (MLP)
    g = jnp.maximum(mm(g, w1) + b1[...], 0.0)
    g = jnp.maximum(mm(g, w2) + b2[...], 0.0)
    g = mm(g, w3) + b3[...]
    # model3 (fingerprint net); BN folded at init, Dropout = identity in eval mode
    f = fing_ref[...]
    for i in range(n_fing):
        f = jnp.maximum(mm(f, fp[2 * i]) + fp[2 * i + 1][...], 0.0)
    f = mm(f, fw_out) + fb_out[...]
    # fully connected head (the [g|f] concat folded into split weights) + predictor
    d = jnp.maximum(mm(g, cw_g) + mm(f, cw_f) + cb[...], 0.0)
    o_ref[...] = mm(d, pw) + pb[...]


def head_forward(params, pool, x_bf, fing, *, tg, vmem_cap):
    G_pad, _ = pool.shape
    n_fing = len(params["fing_layers"])
    args = [pool, x_bf, fing,
            params["mlp_w1"], params["mlp_b1"], params["mlp_w2"], params["mlp_b2"],
            params["mlp_w3"], params["mlp_b3"]]
    for fl in params["fing_layers"]:
        args += [fl["w"], fl["b"]]
    args += [params["fing_wout"], params["fing_bout"],
             params["conn_w_g"], params["conn_w_f"], params["conn_b"],
             params["pred_w"], params["pred_b"]]
    in_specs = []
    for i, a in enumerate(args):
        if i in (0, 2):                                 # pool / fingerprint: tiled over graphs
            in_specs.append(pl.BlockSpec((tg, a.shape[1]), lambda g: (g, 0)))
        else:                                           # node features + weights: resident
            in_specs.append(pl.BlockSpec(a.shape, lambda g: (0, 0)))
    out_specs = pl.BlockSpec((tg, 1), lambda g: (g, 0))
    need = 2 * sum(int(a.size) * a.dtype.itemsize for a in args) + (8 << 20)
    return pl.pallas_call(
        functools.partial(_head_kernel, n_fing=n_fing),
        out_shape=jax.ShapeDtypeStruct((G_pad, 1), jnp.float32),
        grid_spec=pltpu.PrefetchScalarGridSpec(
            num_scalar_prefetch=0, grid=(G_pad // tg,),
            in_specs=in_specs, out_specs=out_specs),
        compiler_params=_compiler_params(("parallel",), _clamp_vmem(need, vmem_cap)),
    )(*args)


# --------------------------- parameter setup (all folding done once here) ---------------------------

def _dense(key, fan_in, fan_out):
    kw, kb = jax.random.split(key)
    bound = 1.0 / math.sqrt(fan_in)
    w = jax.random.uniform(kw, (fan_in, fan_out), jnp.float32, -bound, bound)
    b = jax.random.uniform(kb, (fan_out,), jnp.float32, -bound, bound)
    return w, b


def _bn_defaults(n):
    # PyTorch/PyG BatchNorm init: gamma=1, beta=0, running_mean=0, running_var=1
    return dict(gamma=jnp.ones((n,), jnp.float32), beta=jnp.zeros((n,), jnp.float32),
                mean=jnp.zeros((n,), jnp.float32), var=jnp.ones((n,), jnp.float32))


def fold_bn(w, b, gamma, beta, mean, var, eps=1e-5):
    s = gamma / jnp.sqrt(var + eps)
    return w * s[None, :], b * s + (beta - mean * s)


def init_params(key, cfg):
    F = cfg["graphin"]
    T = TOWERS
    F_out = F // T
    C = T * F
    Fp = _round_up(F, 128)           # lane-padded node-feature width
    Cp = _round_up(C, 128)           # lane-padded message width
    bf16 = jnp.bfloat16
    keys = iter(jax.random.split(key, 256))
    params = {"pna_layers": [], "fing_layers": [], "feat_pad": Fp}

    for _ in range(cfg["npnalayers"]):
        p = {}
        w_edge, b_edge = _dense(next(keys), cfg["edgedim"], F)
        p["w_edge"], p["b_edge"] = w_edge.astype(bf16), b_edge.reshape(1, F)

        # per-tower pre-NNs as one (3F -> T*F) matmul; rows split so no concat is needed
        w_pre, b_pre = _dense(next(keys), 3 * F, C)
        p["w_pre_d"] = _pad2(w_pre[:F], Fp, Cp).astype(bf16)
        p["w_pre_s"] = _pad2(w_pre[F:2 * F], Fp, Cp).astype(bf16)
        p["w_pre_e"] = _pad2(w_pre[2 * F:], F, Cp).astype(bf16)
        p["b_pre"] = _pad2(b_pre.reshape(1, C), 1, Cp)

        # per-tower post-NNs
        wp, bp = [], []
        for _ in range(T):
            w, b = _dense(next(keys), (NUM_AGG * NUM_SCALERS + 1) * F, F_out)
            wp.append(w)
            bp.append(b)

        # conv output Linear with eval-mode BatchNorm folded in, then folded into the post
        # weights (scalers are per-row, so the fold is exact up to reassociation)
        w_lin, b_lin = _dense(next(keys), F, F)
        w_lin, b_lin = fold_bn(w_lin, b_lin, **_bn_defaults(F))
        w_lin_t = [w_lin[t * F_out:(t + 1) * F_out, :] for t in range(T)]

        wx = sum(wp[t][:F, :] @ w_lin_t[t] for t in range(T))                 # (F, F)
        p["w_x"] = _pad2(wx, Fp, Fp).astype(bf16)

        for a, name in enumerate(("w_agg_mean", "w_agg_min", "w_agg_max", "w_agg_std")):
            blk = jnp.zeros((Cp, NUM_SCALERS * Fp), jnp.float32)
            for s in range(NUM_SCALERS):
                rows = jnp.concatenate(
                    [wp[t][F + (s * NUM_AGG + a) * F: F + (s * NUM_AGG + a + 1) * F, :] @ w_lin_t[t]
                     for t in range(T)], axis=0)                              # (C, F)
                blk = blk.at[:C, s * Fp: s * Fp + F].set(rows)
            p[name] = blk.astype(bf16)
        p["b_out"] = _pad2((jnp.concatenate(bp) @ w_lin + b_lin).reshape(1, F), 1, Fp)
        params["pna_layers"].append(p)

    # model2 (MLP on pooled graph features)
    w, b = _dense(next(keys), F, cfg["mlpnode"])
    params["mlp_w1"], params["mlp_b1"] = _pad2(w, Fp, cfg["mlpnode"]).astype(bf16), b.reshape(1, -1)
    w, b = _dense(next(keys), cfg["mlpnode"], cfg["mlpnode"])
    params["mlp_w2"], params["mlp_b2"] = w.astype(bf16), b.reshape(1, -1)
    w, b = _dense(next(keys), cfg["mlpnode"], cfg["mlpout"])
    params["mlp_w3"], params["mlp_b3"] = w.astype(bf16), b.reshape(1, -1)

    # model3 (fingerprint net, BN folded)
    in_dim = cfg["fingdim"]
    for _ in range(cfg["nfinglayers"]):
        w, b = _dense(next(keys), in_dim, cfg["fingernode"])
        w, b = fold_bn(w, b, **_bn_defaults(cfg["fingernode"]))
        params["fing_layers"].append({"w": w.astype(bf16), "b": b.reshape(1, -1)})
        in_dim = cfg["fingernode"]
    w, b = _dense(next(keys), cfg["fingernode"], cfg["fingerout"])
    params["fing_wout"], params["fing_bout"] = w.astype(bf16), b.reshape(1, -1)

    # connected head ([g|f] concat split) + predictor
    w, b = _dense(next(keys), cfg["mlpout"] + cfg["fingerout"], cfg["predictnode"])
    params["conn_w_g"] = w[:cfg["mlpout"]].astype(bf16)
    params["conn_w_f"] = w[cfg["mlpout"]:].astype(bf16)
    params["conn_b"] = b.reshape(1, -1)
    w, b = _dense(next(keys), cfg["predictnode"], 1)
    params["pred_w"], params["pred_b"] = w.astype(bf16), b.reshape(1, 1)
    return params


# --------------------------- forward pass ---------------------------

def net_forward(params, x, edge_index, edge_attr, batch, fingerprint, num_graphs, avg_log):
    f32, bf16 = jnp.float32, jnp.bfloat16
    x = x.reshape(x.shape[0], -1).astype(f32)          # mirrors x.squeeze() for (N,1,F)/(N,F)
    N, F = x.shape
    E = edge_index.shape[1]
    src, dst = edge_index[0], edge_index[1]            # message flow: source -> target
    Fp = params["feat_pad"]
    Cp = params["pna_layers"][0]["b_pre"].shape[1]
    cap = _vmem_capacity_bytes()

    # ---- tiling: node tiles on the parallel grid axis, edge chunks from a VMEM budget ----
    if N <= 128:
        tn = _round_up(max(N, 8), 16)
        N_pad = tn
    else:
        tn = 128
        N_pad = _round_up(N, tn)
    e_chunk = max(128, (cap // 4) // (tn * Cp * 4 * 2) // 128 * 128)   # ~half on 64 MiB v7x
    e_chunk = min(e_chunk, _round_up(E, 128), 2048)
    E_pad = _round_up(E, e_chunk)

    # ---- graph structure, built once and reused by every PNA layer ----
    node_ids = jnp.arange(N_pad)
    dst_oh = (dst[:, None] == node_ids[None, :]).astype(f32)           # (E, N_pad): gathers x_i
    src_oh = (src[:, None] == node_ids[None, :]).astype(f32)           # (E, N_pad): gathers x_j
    # adj is kept as a second (node-major) copy so every in-kernel matmul is a plain
    # (row-major) contraction; TODO(synk): index-based gather would remove both copies.
    adj = dst_oh.T                                                     # (N_pad, E)
    deg = adj.sum(axis=1, keepdims=True)
    deg_c = jnp.maximum(deg, 1.0)                                      # PyG clamps deg >= 1
    logd = jnp.log(deg_c + 1.0)
    stats = jnp.concatenate([1.0 / deg_c, logd / avg_log, avg_log / logd,
                             (deg > 0).astype(f32)], axis=1)           # (N_pad, 4)

    dst_oh = jnp.pad(dst_oh, ((0, E_pad - E), (0, 0))).astype(bf16)
    src_oh = jnp.pad(src_oh, ((0, E_pad - E), (0, 0))).astype(bf16)
    adj = jnp.pad(adj, ((0, 0), (0, E_pad - E))).astype(bf16)
    edge_attr = jnp.pad(edge_attr.astype(f32), ((0, E_pad - E), (0, 0))).astype(bf16)
    x_bf = jnp.pad(x, ((0, N_pad - N), (0, Fp - F))).astype(bf16)

    # ---- PNA stack: [edge-message kernel -> node-update kernel] per layer ----
    for p in params["pna_layers"]:
        m32, mbf, msq = pna_edge_messages(x_bf, edge_attr, dst_oh, src_oh, p,
                                          te=e_chunk, vmem_cap=cap)
        x_bf = pna_node_update(adj, m32, mbf, msq, x_bf, stats, p,
                               tn=tn, e_chunk=e_chunk, vmem_cap=cap)

    # ---- global_add_pool + MLP + fingerprint + connected head + predictor ----
    G = int(num_graphs)
    if G <= 256:
        tg = _round_up(max(G, 8), 8)
        G_pad = tg
    else:
        tg = 256
        G_pad = _round_up(G, tg)
    pool = (jnp.arange(G_pad)[:, None] == batch[None, :]).astype(f32)  # (G_pad, N)
    pool = jnp.pad(pool, ((0, 0), (0, N_pad - N))).astype(bf16)
    fing = jnp.pad(fingerprint.astype(f32), ((0, G_pad - G), (0, 0))).astype(bf16)
    out = head_forward(params, pool, x_bf, fing, tg=tg, vmem_cap=cap)  # (G_pad, 1)
    return out[:G]


# --------------------------- demo ---------------------------

if __name__ == "__main__":
    cfg = dict(npnalayers=2, graphin=20, edgedim=6, predictnode=16,
               nfinglayers=2, fingdim=32, fingernode=24, fingerout=8,
               dropout=0.2, mlpout=12, mlpnode=24)

    key = jax.random.PRNGKey(0)
    k_param, kx, ke, kf = jax.random.split(key, 4)
    params = init_params(k_param, cfg)

    N, G = 10, 2
    x = jax.random.normal(kx, (N, cfg["graphin"]), jnp.float32)
    # two small graphs (nodes 0-4 and 5-9): directed rings + a few extra edges,
    # every node has at least one incoming edge
    ring0 = [(i, (i + 1) % 5) for i in range(5)]
    ring1 = [(5 + i, 5 + (i + 1) % 5) for i in range(5)]
    extra = [(0, 2), (3, 1), (6, 8), (9, 7), (2, 4), (7, 5)]
    edge_index = jnp.array(ring0 + ring1 + extra, dtype=jnp.int32).T          # (2, E)
    E = edge_index.shape[1]
    edge_attr = jax.random.normal(ke, (E, cfg["edgedim"]), jnp.float32)
    batch = jnp.array([0] * 5 + [1] * 5, dtype=jnp.int32)
    fing = jax.random.normal(kf, (G, cfg["fingdim"]), jnp.float32)

    # PNAConv `deg` histogram (in-degree counts) -> average log-degree for the scalers
    in_deg = jnp.sum(edge_index[1][None, :] == jnp.arange(N)[:, None], axis=1)
    deg_hist = jnp.bincount(in_deg, length=int(in_deg.max()) + 1).astype(jnp.float32)
    bins = jnp.arange(deg_hist.shape[0], dtype=jnp.float32)
    avg_log = float(jnp.sum(jnp.log(bins + 1.0) * deg_hist) / jnp.sum(deg_hist))

    out = net_forward(params, x, edge_index, edge_attr, batch, fing, G, avg_log)
    out = jax.block_until_ready(out)
    assert out.shape == (G, 1), out.shape
    assert bool(jnp.all(jnp.isfinite(out)))
    print("KERNEL_OK")
</pallas_src>

<mosaic_0001>
module attributes {stable_mosaic.version = 11 : i64} {
  func.func @_pna_edge_kernel(%arg0: i32, %arg1: memref<128x6xbf16, #tpu.memory_space<vmem>>, %arg2: memref<128x16xbf16, #tpu.memory_space<vmem>>, %arg3: memref<128x16xbf16, #tpu.memory_space<vmem>>, %arg4: memref<16x128xbf16, #tpu.memory_space<vmem>>, %arg5: memref<6x20xbf16, #tpu.memory_space<vmem>>, %arg6: memref<1x20xf32, #tpu.memory_space<vmem>>, %arg7: memref<128x128xbf16, #tpu.memory_space<vmem>>, %arg8: memref<128x128xbf16, #tpu.memory_space<vmem>>, %arg9: memref<20x128xbf16, #tpu.memory_space<vmem>>, %arg10: memref<1x128xf32, #tpu.memory_space<vmem>>, %arg11: memref<128x128xf32, #tpu.memory_space<vmem>>, %arg12: memref<128x128xbf16, #tpu.memory_space<vmem>>, %arg13: memref<128x128xbf16, #tpu.memory_space<vmem>>) attributes {dimension_semantics = [#tpu.dimension_semantics<parallel>], iteration_bounds = array<i64: 1>, scalar_prefetch = 0 : i64, scratch_operands = 0 : i64, tpu.core_type = #tpu.core_type<tc>, window_params = [{transform_indices = @transform_0, window_bounds = array<i64: 128, 6>}, {transform_indices = @transform_1, window_bounds = array<i64: 128, 16>}, {transform_indices = @transform_2, window_bounds = array<i64: 128, 16>}, {pipeline_mode = #tpu.pipeline_mode<synchronous>, transform_indices = @transform_3, window_bounds = array<i64: 16, 128>}, {pipeline_mode = #tpu.pipeline_mode<synchronous>, transform_indices = @transform_4, window_bounds = array<i64: 6, 20>}, {pipeline_mode = #tpu.pipeline_mode<synchronous>, transform_indices = @transform_5, window_bounds = array<i64: 1, 20>}, {pipeline_mode = #tpu.pipeline_mode<synchronous>, transform_indices = @transform_6, window_bounds = array<i64: 128, 128>}, {pipeline_mode = #tpu.pipeline_mode<synchronous>, transform_indices = @transform_7, window_bounds = array<i64: 128, 128>}, {pipeline_mode = #tpu.pipeline_mode<synchronous>, transform_indices = @transform_8, window_bounds = array<i64: 20, 128>}, {pipeline_mode = #tpu.pipeline_mode<synchronous>, transform_indices = @transform_9, window_bounds = array<i64: 1, 128>}, {transform_indices = @transform_10, window_bounds = array<i64: 128, 128>}, {transform_indices = @transform_11, window_bounds = array<i64: 128, 128>}, {transform_indices = @transform_12, window_bounds = array<i64: 128, 128>}]} {
    %c0 = arith.constant 0 : index
    %c0_0 = arith.constant 0 : index
    %0 = vector.load %arg4[%c0, %c0_0] : memref<16x128xbf16, #tpu.memory_space<vmem>>, vector<16x128xbf16>
    %c0_1 = arith.constant 0 : index
    %c0_2 = arith.constant 0 : index
    %1 = vector.load %arg1[%c0_1, %c0_2] : memref<128x6xbf16, #tpu.memory_space<vmem>>, vector<128x6xbf16>
    %c0_3 = arith.constant 0 : index
    %c0_4 = arith.constant 0 : index
    %2 = vector.load %arg5[%c0_3, %c0_4] : memref<6x20xbf16, #tpu.memory_space<vmem>>, vector<6x20xbf16>
    %cst = arith.constant dense<0.000000e+00> : vector<128x20xf32>
    %3 = tpu.matmul %1, %2, %cst {dimension_numbers = #tpu.dot_dimension_numbers<[1], [0], [0], [1], [0, 0, 1, 1], [], []>} : vector<128x6xbf16>, vector<6x20xbf16>, vector<128x20xf32> -> vector<128x20xf32>
    %c0_5 = arith.constant 0 : index
    %c0_6 = arith.constant 0 : index
    %4 = vector.load %arg6[%c0_5, %c0_6] : memref<1x20xf32, #tpu.memory_space<vmem>>, vector<1x20xf32>
    %5 = vector.broadcast %4 : vector<1x20xf32> to vector<128x20xf32>
    %6 = arith.addf %3, %5 : vector<128x20xf32>
    %c0_7 = arith.constant 0 : index
    %c0_8 = arith.constant 0 : index
    %7 = vector.load %arg2[%c0_7, %c0_8] : memref<128x16xbf16, #tpu.memory_space<vmem>>, vector<128x16xbf16>
    %cst_9 = arith.constant dense<0.000000e+00> : vector<128x128xf32>
    %8 = tpu.matmul %7, %0, %cst_9 {dimension_numbers = #tpu.dot_dimension_numbers<[1], [0], [0], [1], [0, 0, 1, 1], [], []>} : vector<128x16xbf16>, vector<16x128xbf16>, vector<128x128xf32> -> vector<128x128xf32>
    %c0_10 = arith.constant 0 : index
    %c0_11 = arith.constant 0 : index
    %9 = vector.load %arg3[%c0_10, %c0_11] : memref<128x16xbf16, #tpu.memory_space<vmem>>, vector<128x16xbf16>
    %cst_12 = arith.constant dense<0.000000e+00> : vector<128x128xf32>
    %10 = tpu.matmul %9, %0, %cst_12 {dimension_numbers = #tpu.dot_dimension_numbers<[1], [0], [0], [1], [0, 0, 1, 1], [], []>} : vector<128x16xbf16>, vector<16x128xbf16>, vector<128x128xf32> -> vector<128x128xf32>
    %11 = arith.truncf %8 : vector<128x128xf32> to vector<128x128xbf16>
    %c0_13 = arith.constant 0 : index
    %c0_14 = arith.constant 0 : index
    %12 = vector.load %arg7[%c0_13, %c0_14] : memref<128x128xbf16, #tpu.memory_space<vmem>>, vector<128x128xbf16>
    %cst_15 = arith.constant dense<0.000000e+00> : vector<128x128xf32>
    %13 = tpu.matmul %11, %12, %cst_15 {dimension_numbers = #tpu.dot_dimension_numbers<[1], [0], [0], [1], [0, 0, 1, 1], [], []>} : vector<128x128xbf16>, vector<128x128xbf16>, vector<128x128xf32> -> vector<128x128xf32>
    %14 = arith.truncf %10 : vector<128x128xf32> to vector<128x128xbf16>
    %c0_16 = arith.constant 0 : index
    %c0_17 = arith.constant 0 : index
    %15 = vector.load %arg8[%c0_16, %c0_17] : memref<128x128xbf16, #tpu.memory_space<vmem>>, vector<128x128xbf16>
    %cst_18 = arith.constant dense<0.000000e+00> : vector<128x128xf32>
    %16 = tpu.matmul %14, %15, %cst_18 {dimension_numbers = #tpu.dot_dimension_numbers<[1], [0], [0], [1], [0, 0, 1, 1], [], []>} : vector<128x128xbf16>, vector<128x128xbf16>, vector<128x128xf32> -> vector<128x128xf32>
    %17 = arith.addf %13, %16 : vector<128x128xf32>
    %18 = arith.truncf %6 : vector<128x20xf32> to vector<128x20xbf16>
    %c0_19 = arith.constant 0 : index
    %c0_20 = arith.constant 0 : index
    %19 = vector.load %arg9[%c0_19, %c0_20] : memref<20x128xbf16, #tpu.memory_space<vmem>>, vector<20x128xbf16>
    %cst_21 = arith.constant dense<0.000000e+00> : vector<128x128xf32>
    %20 = tpu.matmul %18, %19, %cst_21 {dimension_numbers = #tpu.dot_dimension_numbers<[1], [0], [0], [1], [0, 0, 1, 1], [], []>} : vector<128x20xbf16>, vector<20x128xbf16>, vector<128x128xf32> -> vector<128x128xf32>
    %21 = arith.addf %17, %20 : vector<128x128xf32>
    %c0_22 = arith.constant 0 : index
    %c0_23 = arith.constant 0 : index
    %22 = vector.load %arg10[%c0_22, %c0_23] : memref<1x128xf32, #tpu.memory_space<vmem>>, vector<1x128xf32>
    %23 = vector.broadcast %22 : vector<1x128xf32> to vector<128x128xf32>
    %24 = arith.addf %21, %23 : vector<128x128xf32>
    %c0_24 = arith.constant 0 : index
    %c0_25 = arith.constant 0 : index
    %25 = vector.load %arg11[%c0_24, %c0_25] : memref<128x128xf32, #tpu.memory_space<vmem>>, vector<128x128xf32>
    tpu.vector_store %arg11[%c0_24, %c0_25], %24 {strides = array<i32>} : memref<128x128xf32, #tpu.memory_space<vmem>>, vector<128x128xf32>,
    %26 = arith.truncf %24 : vector<128x128xf32> to vector<128x128xbf16>
    %c0_26 = arith.constant 0 : index
    %c0_27 = arith.constant 0 : index
    %27 = vector.load %arg12[%c0_26, %c0_27] : memref<128x128xbf16, #tpu.memory_space<vmem>>, vector<128x128xbf16>
    tpu.vector_store %arg12[%c0_26, %c0_27], %26 {strides = array<i32>} : memref<128x128xbf16, #tpu.memory_space<vmem>>, vector<128x128xbf16>,
    %28 = arith.mulf %24, %24 : vector<128x128xf32>
    %29 = arith.truncf %28 : vector<128x128xf32> to vector<128x128xbf16>
    %c0_28 = arith.constant 0 : index
    %c0_29 = arith.constant 0 : index
    %30 = vector.load %arg13[%c0_28, %c0_29] : memref<128x128xbf16, #tpu.memory_space<vmem>>, vector<128x128xbf16>
    tpu.vector_store %arg13[%c0_28, %c0_29], %29 {strides = array<i32>} : memref<128x128xbf16, #tpu.memory_space<vmem>>, vector<128x128xbf16>,
    return
  }
  func.func @transform_0(%arg0: i32) -> (i32, i32) {
    %c0_i32 = arith.constant 0 : i32
    %c0_i32_0 = arith.constant 0 : i32
    return %arg0, %c0_i32 : i32, i32
  }
  func.func @transform_1(%arg0: i32) -> (i32, i32) {
    %c0_i32 = arith.constant 0 : i32
    %c0_i32_0 = arith.constant 0 : i32
    return %arg0, %c0_i32 : i32, i32
  }
  func.func @transform_2(%arg0: i32) -> (i32, i32) {
    %c0_i32 = arith.constant 0 : i32
    %c0_i32_0 = arith.constant 0 : i32
    return %arg0, %c0_i32 : i32, i32
  }
  func.func @transform_3(%arg0: i32) -> (i32, i32) {
    %c0_i32 = arith.constant 0 : i32
    %c0_i32_0 = arith.constant 0 : i32
    %c0_i32_1 = arith.constant 0 : i32
    return %c0_i32, %c0_i32_0 : i32, i32
  }
  func.func @transform_4(%arg0: i32) -> (i32, i32) {
    %c0_i32 = arith.constant 0 : i32
    %c0_i32_0 = arith.constant 0 : i32
    %c0_i32_1 = arith.constant 0 : i32
    return %c0_i32, %c0_i32_0 : i32, i32
  }
  func.func @transform_5(%arg0: i32) -> (i32, i32) {
    %c0_i32 = arith.constant 0 : i32
    %c0_i32_0 = arith.constant 0 : i32
    %c0_i32_1 = arith.constant 0 : i32
    return %c0_i32, %c0_i32_0 : i32, i32
  }
  func.func @transform_6(%arg0: i32) -> (i32, i32) {
    %c0_i32 = arith.constant 0 : i32
    %c0_i32_0 = arith.constant 0 : i32
    %c0_i32_1 = arith.constant 0 : i32
    return %c0_i32, %c0_i32_0 : i32, i32
  }
  func.func @transform_7(%arg0: i32) -> (i32, i32) {
    %c0_i32 = arith.constant 0 : i32
    %c0_i32_0 = arith.constant 0 : i32
    %c0_i32_1 = arith.constant 0 : i32
    return %c0_i32, %c0_i32_0 : i32, i32
  }
  func.func @transform_8(%arg0: i32) -> (i32, i32) {
    %c0_i32 = arith.constant 0 : i32
    %c0_i32_0 = arith.constant 0 : i32
    %c0_i32_1 = arith.constant 0 : i32
    return %c0_i32, %c0_i32_0 : i32, i32
  }
  func.func @transform_9(%arg0: i32) -> (i32, i32) {
    %c0_i32 = arith.constant 0 : i32
    %c0_i32_0 = arith.constant 0 : i32
    %c0_i32_1 = arith.constant 0 : i32
    return %c0_i32, %c0_i32_0 : i32, i32
  }
  func.func @transform_10(%arg0: i32) -> (i32, i32) {
    %c0_i32 = arith.constant 0 : i32
    %c0_i32_0 = arith.constant 0 : i32
    return %arg0, %c0_i32 : i32, i32
  }
  func.func @transform_11(%arg0: i32) -> (i32, i32) {
    %c0_i32 = arith.constant 0 : i32
    %c0_i32_0 = arith.constant 0 : i32
    return %arg0, %c0_i32 : i32, i32
  }
  func.func @transform_12(%arg0: i32) -> (i32, i32) {
    %c0_i32 = arith.constant 0 : i32
    %c0_i32_0 = arith.constant 0 : i32
    return %arg0, %c0_i32 : i32, i32
  }
}

</mosaic_0001>

<bundles_post_ra>
// kernel: tpu_custom_call.1
= control target key start
LH: loop header
LB: loop body
LE: loop exit
PB: predicated region body
PF: predicated region fallthrough
CT: control target
= control target key end

     0   :  { %18 = vsyncpa [#allocation3], 0  ;;  %vm129_vm0 = vcmask 1042432   ;;  %vm104_vm1 = vcmask 48128   ;;  %s1697_s0 = inlined_call_operand.vmem [shape: bf16[128,6], index: 0, kind: input, shape index: {}]   ;;  %s1698_s1 = inlined_call_operand.vmem [shape: bf16[128,16], index: 1, kind: input, shape index: {}]   ;;  %s1699_s2 = inlined_call_operand.vmem [shape: bf16[128,16], index: 2, kind: input, shape index: {}]   ;;  %s1700_s3 = inlined_call_operand.vmem [shape: bf16[16,128], index: 3, kind: input, shape index: {}]   ;;  %s1701_s4 = inlined_call_operand.vmem [shape: bf16[6,20], index: 4, kind: input, shape index: {}]   ;;  %s1702_s5 = inlined_call_operand.vmem [shape: f32[1,20], index: 5, kind: input, shape index: {}]   ;;  %s1703_s6 = inlined_call_operand.vmem [shape: bf16[128,128], index: 6, kind: input, shape index: {}]   ;;  %s1704_s7 = inlined_call_operand.vmem [shape: bf16[128,128], index: 7, kind: input, shape index: {}]   ;;  %s1705_s8 = inlined_call_operand.vmem [shape: bf16[20,128], index: 8, kind: input, shape index: {}]   ;;  %s1706_s9 = inlined_call_operand.vmem [shape: f32[1,128], index: 9, kind: input, shape index: {}]   ;;  %s1707_s10 = inlined_call_operand.hbm [shape: f32[128,128], index: 10, kind: output, shape index: {0}]   ;;  %s1708_s11 = inlined_call_operand.hbm [shape: bf16[128,128], index: 11, kind: output, shape index: {1}]   ;;  %s1709_s12 = inlined_call_operand.hbm [shape: bf16[128,128], index: 12, kind: output, shape index: {2}]  }
   0x1   :  { %v59_v0 = vld [vmem:[%s1701_s4] sm:$0x7] }
   0x2   :  { %v131_v1 = vsel %vm129_vm0, %v59_v0, 0  ;;  %v1173_v2 = vld [vmem:[%s1697_s0] sm:$0xff] }
   0x3   :  { %v1177_v3 = vld [vmem:[%s1697_s0 + $0x20] sm:$0xff]  ;;  %140 = vmatpush.bf16.msra.mxu0 %v131_v1  ;;  %1308 = vmatpush.bf16.msra.mxu2 %v131_v1 }
   0x4   :  { %v1172_v4 = vld [vmem:[%s1700_s3] sm:$0xff] }
   0x5   :  { %276 = vmatpush.bf16.msra.mxu1 %v1172_v4 }
   0x7   :  { %405 = vmatpush.bf16.msrb.mxu2 %v1172_v4 }
   0x8   :  { %19 = vsyncpa [#allocation5], 0  ;;  %1309 = vmatpush.bf16.msra.mxu3 %v1172_v4  ;;  %1004 = vmatmul.msk.bf16.vlgmr.msra.gmra.mxu0 %vm104_vm1, %v1173_v2  ;;  %v1174_v5 = vld [vmem:[%s1697_s0 + $0x8] sm:$0xff]  ;;  %v1181_v7 = vld [vmem:[%s1698_s1] sm:$0xff]  ;;  %vm244_vm2 = vcmask 130048   ;;  %vm734_vm3 = vcmask 1041408  }
   0x9   :  { %1008 = vmatmul.msk.bf16.vlgmr.msra.gmra.mxu2 %vm104_vm1, %v1177_v3  ;;  %v1178_v6 = vld [vmem:[%s1697_s0 + $0x28] sm:$0xff]  ;;  %1048 = vmatmul.msk.bf16.vlgmr.msra.gmra.mxu1 %vm244_vm2, %v1181_v7  ;;  %v1175_v8 = vld [vmem:[%s1697_s0 + $0x10] sm:$0xff]  ;;  %v1176_v11 = vld [vmem:[%s1697_s0 + $0x18] sm:$0xff]  ;;  %vm709_vm4 = vcmask 162816   ;;  %s938_s24 = sshll.u32 %s1708_s11, 4  ;;  %s1396_s25 = smov [#allocation2]   ;;  %s939_s24 = int_to_ptr.hbm [resolvable:$true] %s938_s24 }
   0xa   :  { %v1179_v9 = vld [vmem:[%s1697_s0 + $0x30] sm:$0xff]  ;;  %v1182_v10 = vld [vmem:[%s1698_s1 + $0x8] sm:$0xff]  ;;  %v1180_v12 = vld [vmem:[%s1697_s0 + $0x38] sm:$0xff]  ;;  %s923_s26 = sshll.u32 %s1396_s25, 4  ;;  %s1397_s4 = smov [#allocation6]   ;;  %s924_s26 = int_to_ptr.vmem [resolvable:$true] %s923_s26 }
   0xb   :  { %v1183_v13 = vld [vmem:[%s1698_s1 + $0x10] sm:$0xff]  ;;  %v1189_v14 = vld [vmem:[%s1699_s2] sm:$0xff]  ;;  %v1184_v15 = vld [vmem:[%s1698_s1 + $0x18] sm:$0xff]  ;;  %s949_s29 = sshll.u32 %s1397_s4, 4  ;;  %s951_s11 = sshll.u32 %s1709_s12, 4  ;;  %s950_s29 = int_to_ptr.vmem [resolvable:$true] %s949_s29  ;;  %s952_s11 = int_to_ptr.hbm [resolvable:$true] %s951_s11 }
   0xc   :  { %v1190_v16 = vld [vmem:[%s1699_s2 + $0x8] sm:$0xff]  ;;  %v1185_v17 = vld [vmem:[%s1698_s1 + $0x20] sm:$0xff]  ;;  %v1191_v18 = vld [vmem:[%s1699_s2 + $0x10] sm:$0xff]  ;;  %s1398_s13 = smov 128   ;;  %s1400_s3 = smov 64  }
   0xd   :  { %1052 = vmatmul.msk.bf16.vlgmr.msra.gmra.mxu3 %vm244_vm2, %v1185_v17  ;;  %v699_v19 = vld [vmem:[%s1705_s8 + $0x8] sm:$0x3]  ;;  %v1213_v24 = vld [vmem:[%s1705_s8] sm:$0xff]  ;;  %v1192_v25 = vld [vmem:[%s1699_s2 + $0x18] sm:$0xff]  ;;  %s925_s8 = sshll.u32 %s1707_s10, 4  ;;  %s1399_s10 = smov 8   ;;  %s926_s8 = int_to_ptr.hbm [resolvable:$true] %s925_s8 }
   0xe   :  { %v705_v20 = vunpack.c.l.b16 %v699_v19  ;;  %v1186_v23 = vld [vmem:[%s1698_s1 + $0x28] sm:$0xff]  ;;  %v1212_v26 = vld [vmem:[%s1704_s7 + $0x38] sm:$0xff]  ;;  %v1187_v28 = vld [vmem:[%s1698_s1 + $0x30] sm:$0xff]  ;;  %s1401_s14 = smov 4  }
   0xf   :  { %543 = vmatpush.bf16.msrb.mxu3 %v1212_v26  ;;  %v1204_v27 = vld [vmem:[%s1703_s6 + $0x38] sm:$0xff]  ;;  %v1211_v29 = vld [vmem:[%s1704_s7 + $0x30] sm:$0xff]  ;;  %v1193_v30 = vld [vmem:[%s1699_s2 + $0x20] sm:$0xff] }
  0x10   :  { %v707_v21 = vpack.c.b16 %v705_v20, %v705_v20  ;;  %640 = vmatpush.bf16.msrb.mxu0 %v1204_v27  ;;  %v1203_v32 = vld [vmem:[%s1703_s6 + $0x30] sm:$0xff]  ;;  %v1210_v33 = vld [vmem:[%s1704_s7 + $0x28] sm:$0xff]  ;;  %v1576_v34 = vld [vmem:[%s1702_s5] ss:$0 sm:$0xff] }
  0x11   :  { %v1202_v38 = vld [vmem:[%s1703_s6 + $0x28] sm:$0xff]  ;;  %v1188_v39 = vld [vmem:[%s1698_s1 + $0x38] sm:$0xff]  ;;  %v1209_v43 = vld [vmem:[%s1704_s7 + $0x20] sm:$0xff] }
  0x12   :  { %v736_v22 = vsel %vm734_vm3, %v707_v21, 0  ;;  %v1194_v46 = vld [vmem:[%s1699_s2 + $0x28] sm:$0xff]  ;;  %v1201_v49 = vld [vmem:[%s1703_s6 + $0x20] sm:$0xff]  ;;  %v1208_v50 = vld [vmem:[%s1704_s7 + $0x18] sm:$0xff] }
  0x13   :  { %744 = vmatpush.bf16.msrb.mxu1 %v736_v22  ;;  %544 = vmatpush.bf16.msrb.mxu3 %v1211_v29  ;;  %v1200_v52 = vld [vmem:[%s1703_s6 + $0x18] sm:$0xff]  ;;  %v1199_v57 = vld [vmem:[%s1703_s6 + $0x10] sm:$0xff]  ;;  %v1198_v62 = vld [vmem:[%s1703_s6 + $0x8] sm:$0xff] }
  0x14   :  { %641 = vmatpush.bf16.msrb.mxu0 %v1203_v32  ;;  %v1207_v59 = vld [vmem:[%s1704_s7 + $0x10] sm:$0xff]  ;;  %v1206_v3 = vld [vmem:[%s1704_s7 + $0x8] sm:$0xff]  ;;  %v1197_v4 = vld [vmem:[%s1703_s6] sm:$0xff] }
  0x15   :  { %v1195_v0 = vld [vmem:[%s1699_s2 + $0x30] sm:$0xff]  ;;  %v1196_v17 = vld [vmem:[%s1699_s2 + $0x38] sm:$0xff] }
  0x17   :  { %745 = vmatpush.bf16.msrb.mxu1 %v1213_v24  ;;  %545 = vmatpush.bf16.msrb.mxu3 %v1210_v33 }
  0x18   :  { %1005 = vmatmul.msk.bf16.gmra.mxu0 %vm104_vm1, %v1174_v5 }
  0x19   :  { %1009 = vmatmul.msk.bf16.gmra.mxu2 %vm104_vm1, %v1178_v6  ;;  %1049 = vmatmul.msk.bf16.gmra.mxu1 %vm244_vm2, %v1182_v10 }
  0x1a   :  { %642 = vmatpush.bf16.msrb.mxu0 %v1202_v38 }
  0x1b   :  { %546 = vmatpush.bf16.msrb.mxu3 %v1209_v43 }
  0x1d   :  { %1053 = vmatmul.msk.bf16.gmra.mxu3 %vm244_vm2, %v1186_v23 }
  0x1e   :  { %643 = vmatpush.bf16.msrb.mxu0 %v1201_v49 }
  0x1f   :  { %547 = vmatpush.bf16.msrb.mxu3 %v1208_v50 }
  0x22   :  { %644 = vmatpush.bf16.msrb.mxu0 %v1200_v52 }
  0x23   :  { %548 = vmatpush.bf16.msrb.mxu3 %v1207_v59 }
  0x26   :  { %645 = vmatpush.bf16.msrb.mxu0 %v1199_v57 }
  0x27   :  { %549 = vmatpush.bf16.msrb.mxu3 %v1206_v3 }
  0x28   :  { %1006 = vmatmul.msk.bf16.gmra.mxu0 %vm104_vm1, %v1175_v8  ;;  %v1205_v8 = vld [vmem:[%s1704_s7] sm:$0xff] }
  0x29   :  { %1010 = vmatmul.msk.bf16.gmra.mxu2 %vm104_vm1, %v1179_v9  ;;  %1050 = vmatmul.msk.bf16.gmra.mxu1 %vm244_vm2, %v1183_v13 }
  0x2a   :  { %646 = vmatpush.bf16.msrb.mxu0 %v1198_v62 }
  0x2b   :  { %550 = vmatpush.bf16.msrb.mxu3 %v1205_v8 }
  0x2d   :  { %1054 = vmatmul.msk.bf16.gmra.mxu3 %vm244_vm2, %v1187_v28 }
  0x2e   :  { %647 = vmatpush.bf16.msrb.mxu0 %v1197_v4 }
  0x38   :  { %1007 = vmatmul.msk.bf16.gmra.mxu0 %vm104_vm1, %v1176_v11 }
  0x39   :  { %1011 = vmatmul.msk.bf16.gmra.mxu2 %vm104_vm1, %v1180_v12  ;;  %1051 = vmatmul.msk.bf16.gmra.mxu1 %vm244_vm2, %v1184_v15 }
  0x3d   :  { %1055 = vmatmul.msk.bf16.gmra.mxu3 %vm244_vm2, %v1188_v39 }
  0x49   :  { %1088 = vmatmul.msk.bf16.vlgmr.msrb.gmra.mxu2 %vm244_vm2, %v1189_v14 }
  0x59   :  { %1089 = vmatmul.msk.bf16.gmra.mxu2 %vm244_vm2, %v1190_v16 }
  0x69   :  { %1090 = vmatmul.msk.bf16.gmra.mxu2 %vm244_vm2, %v1191_v18 }
  0x79   :  { %1091 = vmatmul.msk.bf16.gmra.mxu2 %vm244_vm2, %v1192_v25 }
  0x85   :  { %v142_v31 = vpop.f32.mrf.mxu0 }
  0x86   :  { %v143_v36 = vadd.f32 %v1576_v34, %v142_v31  ;;  %v278_v60 = vpop.f32.mrf.mxu1 }
  0x89   :  { %1092 = vmatmul.msk.bf16.gmra.mxu2 %vm244_vm2, %v1193_v30 }
  0x8c   :  { %v162_v35 = vpop.f32.mrf.mxu2 }
  0x8d   :  { %v1581_v37 = vadd.f32 %v1576_v34, %v162_v35  ;;  %v144_v40 = vpop.f32.mrf.mxu0 }
  0x8e   :  { %v145_v41 = vadd.f32 %v1576_v34, %v144_v40  ;;  %v280_v5 = vpop.f32.mrf.mxu1 }
  0x8f   :  { %v447_v6 = vpack.c.bf16 %v280_v5, %v278_v60 }
  0x90   :  { %v689_v42 = vpack.c.bf16 %v145_v41, %v143_v36  ;;  %v298_v43 = vpop.f32.mrf.mxu3 }
  0x91   :  { %648 = vmatmul.bf16.vlgmr.msrb.gmra.mxu0 %v447_v6 }
  0x92   :  { %1164 = vmatmul.msk.bf16.vlgmr.msrb.gmra.mxu1 %vm709_vm4, %v689_v42 }
  0x94   :  { %v164_v44 = vpop.f32.mrf.mxu2 }
  0x95   :  { %v1596_v45 = vadd.f32 %v1576_v34, %v164_v44  ;;  %v147_v47 = vpop.f32.mrf.mxu0 }
  0x96   :  { %v148_v53 = vadd.f32 %v1576_v34, %v147_v47  ;;  %v283_v14 = vpop.f32.mrf.mxu1 }
  0x97   :  { %v693_v48 = vpack.c.bf16 %v1596_v45, %v1581_v37 }
  0x99   :  { %1093 = vmatmul.msk.bf16.gmra.mxu2 %vm244_vm2, %v1194_v46  ;;  %v300_v46 = vpop.f32.mrf.mxu3 }
  0x9a   :  { %v451_v47 = vpack.c.bf16 %v300_v46, %v298_v43 }
  0x9c   :  { %v167_v51 = vpop.f32.mrf.mxu2 }
  0x9d   :  { %v1615_v54 = vadd.f32 %v1576_v34, %v167_v51  ;;  %v149_v55 = vpop.f32.mrf.mxu0 }
  0x9e   :  { %v150_v56 = vadd.f32 %v1576_v34, %v149_v55  ;;  %v285_v20 = vpop.f32.mrf.mxu1 }
  0x9f   :  { %v448_v21 = vpack.c.bf16 %v285_v20, %v283_v14 }
  0xa0   :  { %v690_v58 = vpack.c.bf16 %v150_v56, %v148_v53 }
  0xa1   :  { %653 = vmatmul.bf16.gmra.mxu0 %v448_v21  ;;  %v303_v37 = vpop.f32.mrf.mxu3 }
  0xa2   :  { %1165 = vmatmul.msk.bf16.gmra.mxu1 %vm709_vm4, %v690_v58 }
  0xa4   :  { %v169_v61 = vpop.f32.mrf.mxu2 }
  0xa5   :  { %v170_v63 = vadd.f32 %v1576_v34, %v169_v61  ;;  %v152_v1 = vpop.f32.mrf.mxu0 }
  0xa6   :  { %v153_v9 = vadd.f32 %v1576_v34, %v152_v1  ;;  %v288_v28 = vpop.f32.mrf.mxu1 }
  0xa7   :  { %v694_v2 = vpack.c.bf16 %v170_v63, %v1615_v54 }
  0xa9   :  { %1094 = vmatmul.msk.bf16.gmra.mxu2 %vm244_vm2, %v1195_v0  ;;  %v305_v50 = vpop.f32.mrf.mxu3 }
  0xaa   :  { %v452_v51 = vpack.c.bf16 %v305_v50, %v303_v37 }
  0xac   :  { %v172_v7 = vpop.f32.mrf.mxu2 }
  0xad   :  { %v173_v10 = vadd.f32 %v1576_v34, %v172_v7  ;;  %v154_v11 = vpop.f32.mrf.mxu0 }
  0xae   :  { %v155_v12 = vadd.f32 %v1576_v34, %v154_v11  ;;  %v290_v32 = vpop.f32.mrf.mxu1 }
  0xaf   :  { %v449_v33 = vpack.c.bf16 %v290_v32, %v288_v28 }
  0xb0   :  { %v691_v13 = vpack.c.bf16 %v155_v12, %v153_v9 }
  0xb1   :  { %658 = vmatmul.bf16.gmra.mxu0 %v449_v33  ;;  %v308_v53 = vpop.f32.mrf.mxu3 }
  0xb2   :  { %1166 = vmatmul.msk.bf16.gmra.mxu1 %vm709_vm4, %v691_v13 }
  0xb4   :  { %v174_v15 = vpop.f32.mrf.mxu2 }
  0xb5   :  { %v175_v16 = vadd.f32 %v1576_v34, %v174_v15  ;;  %v157_v18 = vpop.f32.mrf.mxu0 }
  0xb6   :  { %v158_v23 = vadd.f32 %v1576_v34, %v157_v18  ;;  %v293_v36 = vpop.f32.mrf.mxu1  ;;  %v1667_v18 = vld [vmem:[%s1706_s9] ss:$0 sm:$0xff]  ;;  %s1395_s9 = smov [#allocation4]  }
  0xb7   :  { %v695_v19 = vpack.c.bf16 %v175_v16, %v173_v10  ;;  %s1684_s22 = sshll.u32 %s1395_s9, 4  ;;  %s937_s22 = int_to_ptr.vmem [resolvable:$true] %s1684_s22 }
  0xb9   :  { %1095 = vmatmul.msk.bf16.gmra.mxu2 %vm244_vm2, %v1196_v17  ;;  %v310_v56 = vpop.f32.mrf.mxu3 }
  0xba   :  { %v453_v57 = vpack.c.bf16 %v310_v56, %v308_v53 }
  0xbc   :  { %v177_v22 = vpop.f32.mrf.mxu2 }
  0xbd   :  { %v178_v24 = vadd.f32 %v1576_v34, %v177_v22  ;;  %v159_v25 = vpop.f32.mrf.mxu0 }
  0xbe   :  { %v160_v26 = vadd.f32 %v1576_v34, %v159_v25  ;;  %v295_v40 = vpop.f32.mrf.mxu1 }
  0xbf   :  { %v450_v41 = vpack.c.bf16 %v295_v40, %v293_v36 }
  0xc0   :  { %v692_v27 = vpack.c.bf16 %v160_v26, %v158_v23 }
  0xc1   :  { %663 = vmatmul.bf16.gmra.mxu0 %v450_v41  ;;  %v313_v59 = vpop.f32.mrf.mxu3 }
  0xc2   :  { %1167 = vmatmul.msk.bf16.gmra.mxu1 %vm709_vm4, %v692_v27 }
  0xc4   :  { %v179_v29 = vpop.f32.mrf.mxu2 }
  0xc5   :  { %v180_v30 = vadd.f32 %v1576_v34, %v179_v29 }
  0xc7   :  { %v696_v31 = vpack.c.bf16 %v180_v30, %v178_v24 }
  0xc9   :  { %v315_v62 = vpop.f32.mrf.mxu3 }
  0xca   :  { %v454_v63 = vpack.c.bf16 %v315_v62, %v313_v59 }
  0xcc   :  { %v407_v35 = vpop.f32.mrf.mxu2 }
  0xd1   :  { %668 = vmatmul.bf16.gmra.mxu0 %v451_v47 }
  0xd2   :  { %1168 = vmatmul.msk.bf16.gmra.mxu1 %vm709_vm4, %v693_v48 }
  0xd4   :  { %v409_v38 = vpop.f32.mrf.mxu2 }
  0xd5   :  { %v471_v39 = vpack.c.bf16 %v409_v38, %v407_v35 }
  0xd7   :  { %551 = vmatmul.bf16.vlgmr.msrb.gmra.mxu3 %v471_v39 }
  0xdc   :  { %v412_v42 = vpop.f32.mrf.mxu2 }
  0xe1   :  { %673 = vmatmul.bf16.gmra.mxu0 %v452_v51 }
  0xe2   :  { %1169 = vmatmul.msk.bf16.gmra.mxu1 %vm709_vm4, %v694_v2 }
  0xe4   :  { %v414_v34 = vpop.f32.mrf.mxu2 }
  0xe5   :  { %v472_v44 = vpack.c.bf16 %v414_v34, %v412_v42 }
  0xe7   :  { %556 = vmatmul.bf16.gmra.mxu3 %v472_v44 }
  0xec   :  { %v417_v49 = vpop.f32.mrf.mxu2 }
  0xf1   :  { %678 = vmatmul.bf16.gmra.mxu0 %v453_v57 }
  0xf2   :  { %1170 = vmatmul.msk.bf16.gmra.mxu1 %vm709_vm4, %v695_v19 }
  0xf4   :  { %v419_v45 = vpop.f32.mrf.mxu2 }
  0xf5   :  { %v473_v48 = vpack.c.bf16 %v419_v45, %v417_v49 }
  0xf7   :  { %561 = vmatmul.bf16.gmra.mxu3 %v473_v48 }
  0xfc   :  { %v422_v52 = vpop.f32.mrf.mxu2 }
 0x101   :  { %683 = vmatmul.bf16.gmra.mxu0 %v454_v63 }
 0x102   :  { %1171 = vmatmul.msk.bf16.gmra.mxu1 %vm709_vm4, %v696_v31 }
 0x104   :  { %v424_v54 = vpop.f32.mrf.mxu2 }
 0x105   :  { %v474_v55 = vpack.c.bf16 %v424_v54, %v422_v52 }
 0x107   :  { %566 = vmatmul.bf16.gmra.mxu3 %v474_v55 }
 0x10c   :  { %v427_v58 = vpop.f32.mrf.mxu2 }
 0x10e   :  { %v649_v7 = vpop.f32.mrf.mxu0 }
 0x10f   :  { %v747_v8 = vpop.f32.mrf.mxu1 }
 0x114   :  { %v429_v60 = vpop.f32.mrf.mxu2 }
 0x115   :  { %v475_v61 = vpack.c.bf16 %v429_v60, %v427_v58 }
 0x116   :  { %v651_v11 = vpop.f32.mrf.mxu0 }
 0x117   :  { %571 = vmatmul.bf16.gmra.mxu3 %v475_v61  ;;  %v749_v12 = vpop.f32.mrf.mxu1 }
 0x11c   :  { %v432_v0 = vpop.f32.mrf.mxu2 }
 0x11e   :  { %v654_v13 = vpop.f32.mrf.mxu0 }
 0x11f   :  { %v752_v14 = vpop.f32.mrf.mxu1 }
 0x124   :  { %v434_v1 = vpop.f32.mrf.mxu2 }
 0x125   :  { %v476_v2 = vpack.c.bf16 %v434_v1, %v432_v0 }
 0x126   :  { %v656_v16 = vpop.f32.mrf.mxu0 }
 0x127   :  { %576 = vmatmul.bf16.gmra.mxu3 %v476_v2  ;;  %v754_v19 = vpop.f32.mrf.mxu1 }
 0x12c   :  { %v437_v3 = vpop.f32.mrf.mxu2 }
 0x12e   :  { %v659_v24 = vpop.f32.mrf.mxu0 }
 0x12f   :  { %v757_v26 = vpop.f32.mrf.mxu1 }
 0x134   :  { %v439_v4 = vpop.f32.mrf.mxu2 }
 0x135   :  { %v477_v5 = vpack.c.bf16 %v439_v4, %v437_v3 }
 0x136   :  { %v661_v36 = vpop.f32.mrf.mxu0 }
 0x137   :  { %581 = vmatmul.bf16.gmra.mxu3 %v477_v5  ;;  %v759_v39 = vpop.f32.mrf.mxu1 }
 0x13c   :  { %v442_v6 = vpop.f32.mrf.mxu2 }
 0x13e   :  { %v664_v34 = vpop.f32.mrf.mxu0 }
 0x13f   :  { %v762_v49 = vpop.f32.mrf.mxu1 }
 0x144   :  { %v444_v9 = vpop.f32.mrf.mxu2 }
 0x145   :  { %v478_v10 = vpack.c.bf16 %v444_v9, %v442_v6 }
 0x146   :  { %v666_v53 = vpop.f32.mrf.mxu0 }
 0x147   :  { %586 = vmatmul.bf16.gmra.mxu3 %v478_v10  ;;  %v764_v55 = vpop.f32.mrf.mxu1 }
 0x14e   :  { %v669_v0 = vpop.f32.mrf.mxu0 }
 0x14f   :  { %v767_v2 = vpop.f32.mrf.mxu1 }
 0x157   :  { %v769_v9 = vpop.f32.mrf.mxu1 }
 0x15a   :  { %v552_v15 = vpop.f32.mrf.mxu3 }
 0x15b   :  { %v650_v17 = vadd.f32 %v649_v7, %v552_v15  ;;  %v671_v7 = vpop.f32.mrf.mxu0 }
 0x15d   :  { %v787_v20 = vadd.f32 %v747_v8, %v650_v17 }
 0x15f   :  { %v807_v21 = vadd.f32 %v1667_v18, %v787_v20  ;;  %v772_v20 = vpop.f32.mrf.mxu1 }
 0x161   :  { %823 = vst [vmem:[#allocation2] sm:$0xff] %v807_v21  ;;  %v871_v28 = vmul.f32 %v807_v21, %v807_v21 }
 0x162   :  { %v554_v22 = vpop.f32.mrf.mxu3 }
 0x163   :  { %v652_v23 = vadd.f32 %v651_v11, %v554_v22 }
 0x165   :  { %v788_v25 = vadd.f32 %v749_v12, %v652_v23 }
 0x167   :  { %v808_v27 = vadd.f32 %v1667_v18, %v788_v25 }
 0x169   :  { %824 = vst [vmem:[#allocation2 + $0x8] sm:$0xff] %v808_v27  ;;  %v1217_v29 = vpack.c.bf16 %v808_v27, %v807_v21  ;;  %v872_v30 = vmul.f32 %v808_v27, %v808_v27 }
 0x16a   :  { %v557_v31 = vpop.f32.mrf.mxu3 }
 0x16b   :  { %1218 = vst [vmem:[#allocation4] sm:$0xff] %v1217_v29   ;;  %v1257_v32 = vpack.c.bf16 %v872_v30, %v871_v28  ;;  %v655_v33 = vadd.f32 %v654_v13, %v557_v31 }
 0x16d   :  { %1258 = vst [vmem:[#allocation6] sm:$0xff] %v1257_v32   ;;  %v789_v35 = vadd.f32 %v752_v14, %v655_v33  ;;  %v774_v32 = vpop.f32.mrf.mxu1 }
 0x16f   :  { %v809_v38 = vadd.f32 %v1667_v18, %v789_v35 }
 0x171   :  { %825 = vst [vmem:[#allocation2 + $0x10] sm:$0xff] %v809_v38  ;;  %v873_v44 = vmul.f32 %v809_v38, %v809_v38 }
 0x172   :  { %v559_v40 = vpop.f32.mrf.mxu3 }
 0x173   :  { %v657_v41 = vadd.f32 %v656_v16, %v559_v40 }
 0x175   :  { %v790_v42 = vadd.f32 %v754_v19, %v657_v41  ;;  %v674_v19 = vpop.f32.mrf.mxu0  ;;  %v777_v41 = vpop.f32.mrf.mxu1 }
 0x177   :  { %v810_v43 = vadd.f32 %v1667_v18, %v790_v42 }
 0x179   :  { %826 = vst [vmem:[#allocation2 + $0x18] sm:$0xff] %v810_v43  ;;  %v1222_v46 = vpack.c.bf16 %v810_v43, %v809_v38  ;;  %v874_v47 = vmul.f32 %v810_v43, %v810_v43 }
 0x17a   :  { %v562_v37 = vpop.f32.mrf.mxu3 }
 0x17b   :  { %1294 = vst [vmem:[#allocation4 + $0x8] sm:$0xff] %v1222_v46   ;;  %v1262_v45 = vpack.c.bf16 %v874_v47, %v873_v44  ;;  %v660_v48 = vadd.f32 %v659_v24, %v562_v37 }
 0x17d   :  { %1301 = vst [vmem:[#allocation6 + $0x8] sm:$0xff] %v1262_v45   ;;  %v791_v50 = vadd.f32 %v757_v26, %v660_v48  ;;  %v676_v28 = vpop.f32.mrf.mxu0 }
 0x17f   :  { %v811_v51 = vadd.f32 %v1667_v18, %v791_v50  ;;  %v779_v50 = vpop.f32.mrf.mxu1 }
 0x181   :  { %827 = vst [vmem:[#allocation2 + $0x20] sm:$0xff] %v811_v51  ;;  %v875_v58 = vmul.f32 %v811_v51, %v811_v51 }
 0x182   :  { %v564_v52 = vpop.f32.mrf.mxu3 }
 0x183   :  { %v662_v54 = vadd.f32 %v661_v36, %v564_v52 }
 0x185   :  { %v792_v56 = vadd.f32 %v759_v39, %v662_v54  ;;  %v679_v39 = vpop.f32.mrf.mxu0 }
 0x187   :  { %v812_v57 = vadd.f32 %v1667_v18, %v792_v56 }
 0x189   :  { %828 = vst [vmem:[#allocation2 + $0x28] sm:$0xff] %v812_v57  ;;  %v1227_v59 = vpack.c.bf16 %v812_v57, %v811_v51  ;;  %v876_v60 = vmul.f32 %v812_v57, %v812_v57 }
 0x18a   :  { %v567_v61 = vpop.f32.mrf.mxu3 }
 0x18b   :  { %1295 = vst [vmem:[#allocation4 + $0x10] sm:$0xff] %v1227_v59   ;;  %v1267_v62 = vpack.c.bf16 %v876_v60, %v875_v58  ;;  %v665_v63 = vadd.f32 %v664_v34, %v567_v61  ;;  %v782_v59 = vpop.f32.mrf.mxu1 }
 0x18d   :  { %1302 = vst [vmem:[#allocation6 + $0x10] sm:$0xff] %v1267_v62   ;;  %v793_v1 = vadd.f32 %v762_v49, %v665_v63  ;;  %v681_v45 = vpop.f32.mrf.mxu0 }
 0x18f   :  { %v813_v3 = vadd.f32 %v1667_v18, %v793_v1 }
 0x191   :  { %829 = vst [vmem:[#allocation2 + $0x30] sm:$0xff] %v813_v3  ;;  %v877_v10 = vmul.f32 %v813_v3, %v813_v3 }
 0x192   :  { %v569_v4 = vpop.f32.mrf.mxu3 }
 0x193   :  { %v667_v5 = vadd.f32 %v666_v53, %v569_v4  ;;  %v784_v4 = vpop.f32.mrf.mxu1 }
 0x195   :  { %v794_v6 = vadd.f32 %v764_v55, %v667_v5  ;;  %v684_v55 = vpop.f32.mrf.mxu0 }
 0x197   :  { %v814_v8 = vadd.f32 %v1667_v18, %v794_v6 }
 0x199   :  { %830 = vst [vmem:[#allocation2 + $0x38] sm:$0xff] %v814_v8  ;;  %v1232_v11 = vpack.c.bf16 %v814_v8, %v813_v3  ;;  %v878_v12 = vmul.f32 %v814_v8, %v814_v8 }
 0x19a   :  { %v572_v13 = vpop.f32.mrf.mxu3 }
 0x19b   :  { %1296 = vst [vmem:[#allocation4 + $0x18] sm:$0xff] %v1232_v11   ;;  %v1272_v14 = vpack.c.bf16 %v878_v12, %v877_v10  ;;  %v670_v15 = vadd.f32 %v669_v0, %v572_v13 }
 0x19d   :  { %1303 = vst [vmem:[#allocation6 + $0x18] sm:$0xff] %v1272_v14   ;;  %v795_v16 = vadd.f32 %v767_v2, %v670_v15  ;;  %v686_v1 = vpop.f32.mrf.mxu0 }
 0x19f   :  { %v815_v17 = vadd.f32 %v1667_v18, %v795_v16 }
 0x1a1   :  { %831 = vst [vmem:[#allocation2 + $0x40] sm:$0xff] %v815_v17  ;;  %v879_v25 = vmul.f32 %v815_v17, %v815_v17 }
 0x1a2   :  { %v574_v21 = vpop.f32.mrf.mxu3 }
 0x1a3   :  { %v672_v22 = vadd.f32 %v671_v7, %v574_v21 }
 0x1a5   :  { %v796_v23 = vadd.f32 %v769_v9, %v672_v22 }
 0x1a7   :  { %v816_v24 = vadd.f32 %v1667_v18, %v796_v23 }
 0x1a9   :  { %832 = vst [vmem:[#allocation2 + $0x48] sm:$0xff] %v816_v24  ;;  %v1237_v26 = vpack.c.bf16 %v816_v24, %v815_v17  ;;  %v880_v27 = vmul.f32 %v816_v24, %v816_v24 }
 0x1aa   :  { %v577_v29 = vpop.f32.mrf.mxu3 }
 0x1ab   :  { %1297 = vst [vmem:[#allocation4 + $0x20] sm:$0xff] %v1237_v26   ;;  %v1277_v30 = vpack.c.bf16 %v880_v27, %v879_v25  ;;  %v675_v31 = vadd.f32 %v674_v19, %v577_v29 }
 0x1ad   :  { %1304 = vst [vmem:[#allocation6 + $0x20] sm:$0xff] %v1277_v30   ;;  %v797_v33 = vadd.f32 %v772_v20, %v675_v31 }
 0x1af   :  { %v817_v35 = vadd.f32 %v1667_v18, %v797_v33 }
 0x1b1   :  { %833 = vst [vmem:[#allocation2 + $0x50] sm:$0xff] %v817_v35  ;;  %v881_v43 = vmul.f32 %v817_v35, %v817_v35 }
 0x1b2   :  { %v579_v36 = vpop.f32.mrf.mxu3 }
 0x1b3   :  { %v677_v38 = vadd.f32 %v676_v28, %v579_v36 }
 0x1b5   :  { %v798_v40 = vadd.f32 %v774_v32, %v677_v38 }
 0x1b7   :  { %v818_v42 = vadd.f32 %v1667_v18, %v798_v40 }
 0x1b9   :  { %834 = vst [vmem:[#allocation2 + $0x58] sm:$0xff] %v818_v42  ;;  %v1242_v34 = vpack.c.bf16 %v818_v42, %v817_v35  ;;  %v882_v44 = vmul.f32 %v818_v42, %v818_v42 }
 0x1ba   :  { %v582_v46 = vpop.f32.mrf.mxu3 }
 0x1bb   :  { %1298 = vst [vmem:[#allocation4 + $0x28] sm:$0xff] %v1242_v34   ;;  %v1282_v47 = vpack.c.bf16 %v882_v44, %v881_v43  ;;  %v680_v49 = vadd.f32 %v679_v39, %v582_v46 }
 0x1bd   :  { %1305 = vst [vmem:[#allocation6 + $0x28] sm:$0xff] %v1282_v47   ;;  %v799_v37 = vadd.f32 %v777_v41, %v680_v49 }
 0x1bf   :  { %v819_v48 = vadd.f32 %v1667_v18, %v799_v37 }
 0x1c1   :  { %835 = vst [vmem:[#allocation2 + $0x60] sm:$0xff] %v819_v48  ;;  %v883_v56 = vmul.f32 %v819_v48, %v819_v48 }
 0x1c2   :  { %v584_v51 = vpop.f32.mrf.mxu3 }
 0x1c3   :  { %v682_v52 = vadd.f32 %v681_v45, %v584_v51 }
 0x1c5   :  { %v800_v53 = vadd.f32 %v779_v50, %v682_v52 }
 0x1c7   :  { %v820_v54 = vadd.f32 %v1667_v18, %v800_v53 }
 0x1c9   :  { %836 = vst [vmem:[#allocation2 + $0x68] sm:$0xff] %v820_v54  ;;  %v1247_v57 = vpack.c.bf16 %v820_v54, %v819_v48  ;;  %v884_v58 = vmul.f32 %v820_v54, %v820_v54 }
 0x1ca   :  { %v587_v60 = vpop.f32.mrf.mxu3 }
 0x1cb   :  { %1299 = vst [vmem:[#allocation4 + $0x30] sm:$0xff] %v1247_v57   ;;  %v1287_v61 = vpack.c.bf16 %v884_v58, %v883_v56  ;;  %v685_v62 = vadd.f32 %v684_v55, %v587_v60 }
 0x1cd   :  { %1306 = vst [vmem:[#allocation6 + $0x30] sm:$0xff] %v1287_v61   ;;  %v801_v63 = vadd.f32 %v782_v59, %v685_v62 }
 0x1cf   :  { %v821_v0 = vadd.f32 %v1667_v18, %v801_v63 }
 0x1d1   :  { %837 = vst [vmem:[#allocation2 + $0x70] sm:$0xff] %v821_v0  ;;  %v885_v7 = vmul.f32 %v821_v0, %v821_v0 }
 0x1d2   :  { %v589_v2 = vpop.f32.mrf.mxu3 }
 0x1d3   :  { %v687_v3 = vadd.f32 %v686_v1, %v589_v2 }
 0x1d5   :  { %v802_v5 = vadd.f32 %v784_v4, %v687_v3 }
 0x1d7   :  { %v822_v6 = vadd.f32 %v1667_v18, %v802_v5 }
 0x1d9   :  { %838 = vst [vmem:[#allocation2 + $0x78] sm:$0xff] %v822_v6  ;;  %v1252_v8 = vpack.c.bf16 %v822_v6, %v821_v0  ;;  %v886_v9 = vmul.f32 %v822_v6, %v822_v6 }
 0x1da   :  { %931 = dma.vmem_to_hbm [thread:$0]  %s924_s26, 2048, %s926_s8, [#allocation3], %s1398_s13, %s1398_s13, %s1399_s10  }
 0x1db   :  { %1300 = vst [vmem:[#allocation4 + $0x38] sm:$0xff] %v1252_v8   ;;  %v1292_v10 = vpack.c.bf16 %v886_v9, %v885_v7 }
 0x1dc   :  { %944 = dma.vmem_to_hbm [thread:$0]  %s937_s22, 1024, %s939_s24, [#allocation5], %s1400_s3, %s1400_s3, %s1401_s14  }
 0x1dd   :  { %1307 = vst [vmem:[#allocation6 + $0x38] sm:$0xff] %v1292_v10  }
 0x1de   :  { %957 = dma.vmem_to_hbm [thread:$0]  %s950_s29, 1024, %s952_s11, [#allocation5], %s1400_s3, %s1400_s3, %s1401_s14  }
 0x1df   :  { %1391 = dma.done.wait [#allocation3], 2048  }
 0x1e0   :  { %1392 = vsyncadd [#allocation3], 4294965248 }
 0x1e1   :  { %1393 = dma.done.wait [#allocation5], 2048  }
 0x1e2   :  { %1394 = vsyncadd [#allocation5], 4294965248 }
 0x1e3   :  { %970 = vsyncpa [#allocation3], 1 }
 0x1e4   :  { %971 = vsyncpa [#allocation5], 1 }

</bundles_post_ra>
